<compile_context>
chip_gen: v7x
topology: tpu7x:2x2x1
jax: 0.10.0
libtpu: 0.0.40
codegen_flags: <defaults>
</compile_context>

<pallas_src>
import math
from functools import partial

import jax
import jax.numpy as jnp
import numpy as np
from jax.experimental import pallas as pl
from jax.experimental.pallas import tpu as pltpu

_MIB = 1024 * 1024


# ----------------------------------------------------------------------------
# Pallas kernels
# ----------------------------------------------------------------------------
def encoder_stack_kernel(x_ref,
                         wqkv_ref, bqkv_ref, wo_ref, bo_ref,
                         ln1w_ref, ln1b_ref,
                         w1_ref, b1_ref, w2_ref, b2_ref,
                         ln2w_ref, ln2b_ref,
                         o_ref, *, Bt, S, nhead, resident, eps=1e-5):
    """All nlayers TransformerEncoderLayers (post-norm, ReLU) for one batch tile.

    Grid is (batch_tiles, nlayers); the output block is resident across the layer
    axis and used as the activation accumulator.  If `resident`, the weight refs
    hold the whole (L, ...) stacks (DMA'd once) and are indexed by the layer grid
    position; otherwise one layer block is streamed per grid step (index 0).
    """
    l = pl.program_id(1)
    li = l if resident else 0

    @pl.when(l == 0)
    def _init():
        o_ref[...] = x_ref[...]

    x = o_ref[...]                                   # (Bt*S, E) f32 resident activations
    E = x.shape[-1]
    hd = E // nhead
    scale = 1.0 / math.sqrt(hd)

    # --- multi-head self attention (all Bt*S rows in the matmul M dimension) ---------
    xb = x.astype(jnp.bfloat16)
    qkv = jnp.dot(xb, wqkv_ref[li], preferred_element_type=jnp.float32) + bqkv_ref[li]
    # fold 1/sqrt(hd) into q: one (Mt,E) VPU pass instead of an (S,S) pass per head
    q3 = (qkv[:, 0:E] * scale).astype(jnp.bfloat16).reshape(Bt, S, E)
    k3 = qkv[:, E:2 * E].astype(jnp.bfloat16).reshape(Bt, S, E)
    v3 = qkv[:, 2 * E:3 * E].astype(jnp.bfloat16).reshape(Bt, S, E)

    # causal mask generated in-kernel (two iota compares on the VPU, no DMA)
    qi = jax.lax.broadcasted_iota(jnp.int32, (S, S), 0)
    ki = jax.lax.broadcasted_iota(jnp.int32, (S, S), 1)
    causal = (ki <= qi)[None, :, :]                  # (1, S, S)

    heads = []
    for h in range(nhead):                           # static loop; einsums are B-batched
        sl = slice(h * hd, (h + 1) * hd)
        s = jnp.einsum('bqd,bkd->bqk', q3[..., sl], k3[..., sl],
                       preferred_element_type=jnp.float32)
        s = jnp.where(causal, s, -1e30)
        s = s - jnp.max(s, axis=-1, keepdims=True)
        p = jnp.exp(s)
        p = p * pl.reciprocal(jnp.sum(p, axis=-1, keepdims=True), approx=True)
        heads.append(jnp.einsum('bqk,bkd->bqd', p.astype(jnp.bfloat16), v3[..., sl],
                                preferred_element_type=jnp.float32))
    attn = jnp.concatenate(heads, axis=-1).reshape(Bt * S, E)
    attn = jnp.dot(attn.astype(jnp.bfloat16), wo_ref[li],
                   preferred_element_type=jnp.float32) + bo_ref[li]

    # residual + LayerNorm1 (f32)
    x1 = x + attn
    mu = jnp.mean(x1, axis=-1, keepdims=True)
    var = jnp.mean((x1 - mu) ** 2, axis=-1, keepdims=True)
    x1 = (x1 - mu) * jax.lax.rsqrt(var + eps) * ln1w_ref[li] + ln1b_ref[li]

    # --- feed forward -----------------------------------------------------------------
    h1 = jnp.dot(x1.astype(jnp.bfloat16), w1_ref[li],
                 preferred_element_type=jnp.float32) + b1_ref[li]
    h1 = jnp.maximum(h1, 0.0)                         # ReLU
    ff = jnp.dot(h1.astype(jnp.bfloat16), w2_ref[li],
                 preferred_element_type=jnp.float32) + b2_ref[li]

    # residual + LayerNorm2 (f32)
    x2 = x1 + ff
    mu2 = jnp.mean(x2, axis=-1, keepdims=True)
    var2 = jnp.mean((x2 - mu2) ** 2, axis=-1, keepdims=True)
    o_ref[...] = (x2 - mu2) * jax.lax.rsqrt(var2 + eps) * ln2w_ref[li] + ln2b_ref[li]


def decoder_kernel(x_ref, w_ref, b_ref, o_ref):
    """Tiled final linear projection to the (128-padded) vocabulary.

    The activation block arrives in f32 and is cast to bf16 in-kernel (removes a
    separate wrapper-side cast pass over the activations in HBM)."""
    x = x_ref[...].astype(jnp.bfloat16)
    o_ref[...] = (jnp.dot(x, w_ref[...], preferred_element_type=jnp.float32)
                  + b_ref[...])


# ----------------------------------------------------------------------------
# VMEM budgeting helpers
# ----------------------------------------------------------------------------
def _vmem_cap_bytes():
    """~75% of physical VMEM from the hardware query, with a safe fallback."""
    try:
        cap = int(getattr(pltpu.get_tpu_info(), "vmem_capacity_bytes"))
        if cap > 0:
            return int(0.75 * cap)
    except Exception:
        pass
    return 48 * _MIB          # conservative: fits v5e/v6e (128 MiB) and v7x (64 MiB)


def _encoder_vmem_bytes(Mt, E, nhid, nhead, S, L, resident):
    """Rough per-grid-step working set: double-buffered blocks + in-kernel temps."""
    Bt = max(Mt // S, 1)
    act = 2 * 2 * Mt * E * 4                               # x in + out accumulator, x2 buffers
    w_layer = (4 * E * E + 2 * E * nhid) * 2               # bf16 matmul weights / layer
    b_layer = (9 * E + nhid) * 4                           # biases + LN params / layer (f32)
    w = 2 * (L if resident else 1) * (w_layer + b_layer)   # x2 buffers
    temps = (Mt * 3 * E * (4 + 2)                          # qkv f32 + bf16
             + Bt * nhead * S * S * (4 + 2)                # scores f32 + probs bf16
             + Mt * nhid * (4 + 2)                         # FFN hidden f32 + bf16
             + 4 * Mt * E * 4)                             # attn / x1 / x2 / misc f32
    return int(1.3 * (act + w + temps))


def _pick_batch_tile(B, S, E, nhid, nhead, L, cap, target_rows=2048):
    """Largest divisor of B whose (Bt*S, E) tile keeps the working set inside `cap`."""
    cands = sorted({c for c in range(1, B + 1)
                    if B % c == 0 and (c == B or (c * S) % 8 == 0)})
    fits = [c for c in cands
            if _encoder_vmem_bytes(c * S, E, nhid, nhead, S, L, False) <= cap]
    if not fits:
        return cands[0]
    good = [c for c in fits if c * S <= target_rows]
    # NOTE: on v7x (2 TensorCores) keeping >= 2 batch tiles lets the "parallel"
    # axis be split across cores; on v5e/v6e one big tile is better.
    return max(good) if good else min(fits)


# ----------------------------------------------------------------------------
# Wrappers calling pallas_call
# ----------------------------------------------------------------------------
def run_encoder_stack(x2d, params, B, S, nhead):
    """x2d: (B*S, E) f32, batch-major rows.  Runs all layers in one pallas_call."""
    M, E = x2d.shape
    L = params["wqkv_t"].shape[0]
    nhid = params["w1_t"].shape[2]

    cap = _vmem_cap_bytes()
    Bt = _pick_batch_tile(B, S, E, nhid, nhead, L, cap)
    Mt = Bt * S
    n_btiles = B // Bt

    # keep the whole stacked weight set VMEM-resident when it fits the budget
    resident = _encoder_vmem_bytes(Mt, E, nhid, nhead, S, L, True) <= cap
    est = _encoder_vmem_bytes(Mt, E, nhid, nhead, S, L, resident)
    vmem_limit = int(min(cap, max(est, 16 * _MIB)))

    def wspec(shape):
        if resident:
            return pl.BlockSpec((L,) + shape, lambda b, l: (0,) * (1 + len(shape)))
        return pl.BlockSpec((1,) + shape, lambda b, l: (l,) + (0,) * len(shape))

    # advisory cost estimate (matmul + attention flops, exp count, HBM traffic)
    w_layer_bytes = (4 * E * E + 2 * E * nhid) * 2
    n_weight_streams = L if resident else L * n_btiles
    cost = pl.CostEstimate(
        flops=int(2 * M * L * (4 * E * E + 2 * E * nhid) + 4 * M * L * S * E),
        transcendentals=int(B * L * nhead * S * S),
        bytes_accessed=int(2 * M * E * 4 + n_weight_streams * w_layer_bytes),
    )

    return pl.pallas_call(
        partial(encoder_stack_kernel, Bt=Bt, S=S, nhead=nhead, resident=resident),
        out_shape=jax.ShapeDtypeStruct((M, E), jnp.float32),
        grid=(n_btiles, L),
        in_specs=[
            pl.BlockSpec((Mt, E), lambda b, l: (b, 0)),      # activations (per batch tile)
            wspec((E, 3 * E)), wspec((1, 3 * E)),            # in-proj W^T (bf16), b
            wspec((E, E)), wspec((1, E)),                    # out-proj W^T (bf16), b
            wspec((1, E)), wspec((1, E)),                    # LN1 w, b
            wspec((E, nhid)), wspec((1, nhid)),              # FF1 W^T (bf16), b
            wspec((nhid, E)), wspec((1, E)),                 # FF2 W^T (bf16), b
            wspec((1, E)), wspec((1, E)),                    # LN2 w, b
        ],
        out_specs=pl.BlockSpec((Mt, E), lambda b, l: (b, 0)),
        compiler_params=pltpu.CompilerParams(
            dimension_semantics=("parallel", "arbitrary"),
            vmem_limit_bytes=vmem_limit),
        cost_estimate=cost,
    )(x2d,
      params["wqkv_t"], params["bqkv"], params["wo_t"], params["bo"],
      params["ln1w"], params["ln1b"],
      params["w1_t"], params["b1"], params["w2_t"], params["b2"],
      params["ln2w"], params["ln2b"])


def run_decoder(x2d, w_pad, b_pad, ntoken):
    """x2d: (M, E) f32.  w_pad: (E, Vp) bf16, b_pad: (1, Vp) f32 (padded once at init).
    Returns (M, ntoken) f32 logits."""
    M, E = x2d.shape
    Vp = w_pad.shape[1]
    cap = _vmem_cap_bytes()

    # vocab tiles: lane-dense, >=256 where possible to fill the wide MXU N dimension
    tv = 512 if Vp % 512 == 0 else (256 if Vp % 256 == 0 else 128)
    # M tiles: bigger tiles amortize weight re-fetch (E*Vp bytes per M-tile)
    if M >= 256:
        tm = 256
        Mp = ((M + tm - 1) // tm) * tm
    else:
        Mp = ((M + 7) // 8) * 8
        tm = Mp
    x_p = x2d if Mp == M else jnp.pad(x2d, ((0, Mp - M), (0, 0)))

    est = 2 * (tm * E * 4 + E * tv * 2 + tv * 4 + tm * tv * 4) + tm * tv * 4
    cost = pl.CostEstimate(
        flops=int(2 * Mp * E * Vp), transcendentals=0,
        bytes_accessed=int(Mp * E * 4 + (Mp // tm) * E * Vp * 2 + Mp * Vp * 4))

    out = pl.pallas_call(
        decoder_kernel,
        out_shape=jax.ShapeDtypeStruct((Mp, Vp), jnp.float32),
        grid=(Mp // tm, Vp // tv),
        in_specs=[
            pl.BlockSpec((tm, E), lambda i, j: (i, 0)),
            pl.BlockSpec((E, tv), lambda i, j: (0, j)),
            pl.BlockSpec((1, tv), lambda i, j: (0, j)),
        ],
        out_specs=pl.BlockSpec((tm, tv), lambda i, j: (i, j)),
        compiler_params=pltpu.CompilerParams(
            dimension_semantics=("parallel", "parallel"),
            vmem_limit_bytes=int(min(cap, max(2 * est, 16 * _MIB)))),
        cost_estimate=cost,
    )(x_p, w_pad, b_pad)
    # TODO(synk): keeping the vocab padded end-to-end would save one HBM pass over the
    # logits; sliced here to match the PyTorch module's (S, B, ntoken) output shape.
    return out[:M, :ntoken]


# ----------------------------------------------------------------------------
# Model glue (embedding lookup, positional encoding, parameter setup)
# ----------------------------------------------------------------------------
def make_positional_encoding(seq_len, d_model):
    position = jnp.arange(seq_len, dtype=jnp.float32)[:, None]
    div_term = jnp.exp(jnp.arange(0, d_model, 2, dtype=jnp.float32)
                       * (-math.log(10000.0) / d_model))
    pe = jnp.zeros((seq_len, d_model), dtype=jnp.float32)
    pe = pe.at[:, 0::2].set(jnp.sin(position * div_term))
    pe = pe.at[:, 1::2].set(jnp.cos(position * div_term))
    return pe[:, None, :]                                   # (S, 1, E)


def init_params(key, ntoken, ninp, nhead, nhid, nlayers):
    keys = iter(jax.random.split(key, 2 + 6 * nlayers))
    emb_w = jax.random.uniform(next(keys), (ntoken, ninp), jnp.float32, -0.1, 0.1)
    dec_w = jax.random.uniform(next(keys), (ntoken, ninp), jnp.float32, -0.1, 0.1)

    wqkv_t, bqkv, wo_t, bo, w1_t, b1, w2_t, b2 = ([] for _ in range(8))
    for _ in range(nlayers):
        wqkv = jax.random.normal(next(keys), (3 * ninp, ninp), jnp.float32) * 0.05
        bqkv.append(jax.random.normal(next(keys), (3 * ninp,), jnp.float32) * 0.02)
        wo = jax.random.normal(next(keys), (ninp, ninp), jnp.float32) * 0.05
        w1 = jax.random.normal(next(keys), (nhid, ninp), jnp.float32) * 0.05
        b1.append(jax.random.normal(next(keys), (nhid,), jnp.float32) * 0.02)
        w2 = jax.random.normal(next(keys), (ninp, nhid), jnp.float32) * 0.05
        wqkv_t.append(wqkv.T)
        wo_t.append(wo.T)
        bo.append(jnp.zeros((ninp,), jnp.float32))
        w1_t.append(w1.T)
        w2_t.append(w2.T)
        b2.append(jnp.zeros((ninp,), jnp.float32))

    # decoder weights padded to a 128-multiple vocab ONCE here (not per forward pass)
    Vp = ((ntoken + 127) // 128) * 128
    dec_w_pad = jnp.zeros((ninp, Vp), jnp.bfloat16).at[:, :ntoken].set(
        dec_w.T.astype(jnp.bfloat16))
    dec_b = jnp.zeros((ntoken,), jnp.float32)
    dec_b_pad = jnp.zeros((1, Vp), jnp.float32).at[:, :ntoken].set(dec_b[None, :])

    # matmul weights stored in bf16 (half DMA bytes, full MXU rate); biases / LN in f32
    return {
        "emb_w": emb_w,
        "dec_w_pad": dec_w_pad,                              # (E, Vp) bf16
        "dec_b": dec_b,
        "dec_b_pad": dec_b_pad,                              # (1, Vp) f32
        "wqkv_t": jnp.stack(wqkv_t).astype(jnp.bfloat16),    # (L, E, 3E)
        "bqkv": jnp.stack(bqkv)[:, None, :],                 # (L, 1, 3E)
        "wo_t": jnp.stack(wo_t).astype(jnp.bfloat16),        # (L, E, E)
        "bo": jnp.stack(bo)[:, None, :],
        "ln1w": jnp.ones((nlayers, 1, ninp), jnp.float32),
        "ln1b": jnp.zeros((nlayers, 1, ninp), jnp.float32),
        "w1_t": jnp.stack(w1_t).astype(jnp.bfloat16),        # (L, E, nhid)
        "b1": jnp.stack(b1)[:, None, :],
        "w2_t": jnp.stack(w2_t).astype(jnp.bfloat16),        # (L, nhid, E)
        "b2": jnp.stack(b2)[:, None, :],
        "ln2w": jnp.ones((nlayers, 1, ninp), jnp.float32),
        "ln2b": jnp.zeros((nlayers, 1, ninp), jnp.float32),
    }


def transformer_forward(src, params, nhead):
    """src: (S, B) int32 token ids.  Returns (S, B, ntoken) f32 logits."""
    S, B = src.shape
    ninp = params["emb_w"].shape[1]
    ntoken = params["emb_w"].shape[0]

    # embedding + scale + positional encoding (glue: gather + elementwise add)
    x = params["emb_w"][src] * math.sqrt(ninp)               # (S, B, E)
    x = x + make_positional_encoding(S, ninp)                # (S, B, E)

    x = jnp.transpose(x, (1, 0, 2)).reshape(B * S, ninp)     # batch-major rows (M, E)
    x = run_encoder_stack(x, params, B, S, nhead)            # fused Pallas encoder stack
    logits = run_decoder(x, params["dec_w_pad"], params["dec_b_pad"], ntoken)
    return logits.reshape(B, S, ntoken).transpose(1, 0, 2)   # (S, B, ntoken)


# ----------------------------------------------------------------------------
# Pure-JAX reference (same math, incl. the bf16 matmul casts) for correctness
# ----------------------------------------------------------------------------
def reference_forward(src, params, nhead):
    S, B = src.shape
    E = params["emb_w"].shape[1]
    ntoken = params["emb_w"].shape[0]
    L = params["wqkv_t"].shape[0]
    hd = E // nhead
    eps = 1e-5
    scale = 1.0 / math.sqrt(hd)

    def bdot(a, w):
        return jnp.dot(a.astype(jnp.bfloat16), w, preferred_element_type=jnp.float32)

    x = params["emb_w"][src] * math.sqrt(E) + make_positional_encoding(S, E)
    x = jnp.transpose(x, (1, 0, 2)).reshape(B * S, E)

    qi = jnp.arange(S)[:, None]
    ki = jnp.arange(S)[None, :]
    causal = (ki <= qi)[None, :, :]

    for l in range(L):
        qkv = bdot(x, params["wqkv_t"][l]) + params["bqkv"][l]
        q3 = (qkv[:, :E] * scale).astype(jnp.bfloat16).reshape(B, S, E)
        k3 = qkv[:, E:2 * E].astype(jnp.bfloat16).reshape(B, S, E)
        v3 = qkv[:, 2 * E:].astype(jnp.bfloat16).reshape(B, S, E)
        heads = []
        for h in range(nhead):
            sl = slice(h * hd, (h + 1) * hd)
            s = jnp.einsum('bqd,bkd->bqk', q3[..., sl], k3[..., sl],
                           preferred_element_type=jnp.float32)
            s = jnp.where(causal, s, -1e30)
            s = s - s.max(-1, keepdims=True)
            p = jnp.exp(s)
            p = p / p.sum(-1, keepdims=True)
            heads.append(jnp.einsum('bqk,bkd->bqd', p.astype(jnp.bfloat16), v3[..., sl],
                                    preferred_element_type=jnp.float32))
        a = jnp.concatenate(heads, -1).reshape(B * S, E)
        a = bdot(a, params["wo_t"][l]) + params["bo"][l]
        x1 = x + a
        mu = x1.mean(-1, keepdims=True)
        var = ((x1 - mu) ** 2).mean(-1, keepdims=True)
        x1 = (x1 - mu) / jnp.sqrt(var + eps) * params["ln1w"][l] + params["ln1b"][l]
        h1 = jnp.maximum(bdot(x1, params["w1_t"][l]) + params["b1"][l], 0.0)
        ff = bdot(h1, params["w2_t"][l]) + params["b2"][l]
        x2 = x1 + ff
        mu2 = x2.mean(-1, keepdims=True)
        var2 = ((x2 - mu2) ** 2).mean(-1, keepdims=True)
        x = (x2 - mu2) / jnp.sqrt(var2 + eps) * params["ln2w"][l] + params["ln2b"][l]

    logits = bdot(x, params["dec_w_pad"])[:, :ntoken] + params["dec_b"][None, :]
    return logits.reshape(B, S, ntoken).transpose(1, 0, 2)


# ----------------------------------------------------------------------------
if __name__ == "__main__":
    ntoken, ninp, nhead, nhid, nlayers = 50, 32, 2, 64, 2
    S, B = 8, 2

    key = jax.random.PRNGKey(0)
    kp, ks = jax.random.split(key)
    params = init_params(kp, ntoken, ninp, nhead, nhid, nlayers)
    src = jax.random.randint(ks, (S, B), 0, ntoken, dtype=jnp.int32)

    fwd = jax.jit(transformer_forward, static_argnums=(2,))
    out = jax.block_until_ready(fwd(src, params, nhead))
    assert out.shape == (S, B, ntoken)

    ref = jax.block_until_ready(reference_forward(src, params, nhead))
    # bf16 matmul inputs + approx softmax reciprocal -> relaxed tolerance vs. f32 math
    np.testing.assert_allclose(np.asarray(out), np.asarray(ref), rtol=2e-2, atol=2e-2)
    print("KERNEL_OK")
</pallas_src>

<mosaic_0001>
module attributes {stable_mosaic.version = 11 : i64} {
  func.func @decoder_kernel(%arg0: i32, %arg1: i32, %arg2: memref<16x32xf32, #tpu.memory_space<vmem>>, %arg3: memref<32x128xbf16, #tpu.memory_space<vmem>>, %arg4: memref<1x128xf32, #tpu.memory_space<vmem>>, %arg5: memref<16x128xf32, #tpu.memory_space<vmem>>) attributes {dimension_semantics = [#tpu.dimension_semantics<parallel>, #tpu.dimension_semantics<parallel>], iteration_bounds = array<i64: 1, 1>, scalar_prefetch = 0 : i64, scratch_operands = 0 : i64, tpu.core_type = #tpu.core_type<tc>, window_params = [{transform_indices = @transform_0, window_bounds = array<i64: 16, 32>}, {transform_indices = @transform_1, window_bounds = array<i64: 32, 128>}, {transform_indices = @transform_2, window_bounds = array<i64: 1, 128>}, {transform_indices = @transform_3, window_bounds = array<i64: 16, 128>}]} {
    %c0 = arith.constant 0 : index
    %c0_0 = arith.constant 0 : index
    %0 = vector.load %arg2[%c0, %c0_0] : memref<16x32xf32, #tpu.memory_space<vmem>>, vector<16x32xf32>
    %1 = arith.truncf %0 : vector<16x32xf32> to vector<16x32xbf16>
    %c0_1 = arith.constant 0 : index
    %c0_2 = arith.constant 0 : index
    %2 = vector.load %arg3[%c0_1, %c0_2] : memref<32x128xbf16, #tpu.memory_space<vmem>>, vector<32x128xbf16>
    %cst = arith.constant dense<0.000000e+00> : vector<16x128xf32>
    %3 = tpu.matmul %1, %2, %cst {dimension_numbers = #tpu.dot_dimension_numbers<[1], [0], [0], [1], [0, 0, 1, 1], [], []>} : vector<16x32xbf16>, vector<32x128xbf16>, vector<16x128xf32> -> vector<16x128xf32>
    %c0_3 = arith.constant 0 : index
    %c0_4 = arith.constant 0 : index
    %4 = vector.load %arg4[%c0_3, %c0_4] : memref<1x128xf32, #tpu.memory_space<vmem>>, vector<1x128xf32>
    %5 = vector.broadcast %4 : vector<1x128xf32> to vector<16x128xf32>
    %6 = arith.addf %3, %5 : vector<16x128xf32>
    %c0_5 = arith.constant 0 : index
    %c0_6 = arith.constant 0 : index
    %7 = vector.load %arg5[%c0_5, %c0_6] : memref<16x128xf32, #tpu.memory_space<vmem>>, vector<16x128xf32>
    tpu.vector_store %arg5[%c0_5, %c0_6], %6 {strides = array<i32>} : memref<16x128xf32, #tpu.memory_space<vmem>>, vector<16x128xf32>,
    return
  }
  func.func @transform_0(%arg0: i32, %arg1: i32) -> (i32, i32) {
    %c0_i32 = arith.constant 0 : i32
    %c0_i32_0 = arith.constant 0 : i32
    return %arg0, %c0_i32 : i32, i32
  }
  func.func @transform_1(%arg0: i32, %arg1: i32) -> (i32, i32) {
    %c0_i32 = arith.constant 0 : i32
    %c0_i32_0 = arith.constant 0 : i32
    return %c0_i32, %arg1 : i32, i32
  }
  func.func @transform_2(%arg0: i32, %arg1: i32) -> (i32, i32) {
    %c0_i32 = arith.constant 0 : i32
    %c0_i32_0 = arith.constant 0 : i32
    return %c0_i32, %arg1 : i32, i32
  }
  func.func @transform_3(%arg0: i32, %arg1: i32) -> (i32, i32) {
    %c0_i32 = arith.constant 0 : i32
    return %arg0, %arg1 : i32, i32
  }
}

module attributes {stable_mosaic.version = 11 : i64} {
  func.func @encoder_stack_kernel(%arg0: i32, %arg1: i32, %arg2: memref<16x32xf32, #tpu.memory_space<vmem>>, %arg3: memref<2x32x96xbf16, #tpu.memory_space<vmem>>, %arg4: memref<2x1x96xf32, #tpu.memory_space<vmem>>, %arg5: memref<2x32x32xbf16, #tpu.memory_space<vmem>>, %arg6: memref<2x1x32xf32, #tpu.memory_space<vmem>>, %arg7: memref<2x1x32xf32, #tpu.memory_space<vmem>>, %arg8: memref<2x1x32xf32, #tpu.memory_space<vmem>>, %arg9: memref<2x32x64xbf16, #tpu.memory_space<vmem>>, %arg10: memref<2x1x64xf32, #tpu.memory_space<vmem>>, %arg11: memref<2x64x32xbf16, #tpu.memory_space<vmem>>, %arg12: memref<2x1x32xf32, #tpu.memory_space<vmem>>, %arg13: memref<2x1x32xf32, #tpu.memory_space<vmem>>, %arg14: memref<2x1x32xf32, #tpu.memory_space<vmem>>, %arg15: memref<16x32xf32, #tpu.memory_space<vmem>>) attributes {dimension_semantics = [#tpu.dimension_semantics<parallel>, #tpu.dimension_semantics<arbitrary>], iteration_bounds = array<i64: 1, 2>, scalar_prefetch = 0 : i64, scratch_operands = 0 : i64, tpu.core_type = #tpu.core_type<tc>, window_params = [{transform_indices = @transform_0, window_bounds = array<i64: 16, 32>}, {pipeline_mode = #tpu.pipeline_mode<synchronous>, transform_indices = @transform_1, window_bounds = array<i64: 2, 32, 96>}, {pipeline_mode = #tpu.pipeline_mode<synchronous>, transform_indices = @transform_2, window_bounds = array<i64: 2, 1, 96>}, {pipeline_mode = #tpu.pipeline_mode<synchronous>, transform_indices = @transform_3, window_bounds = array<i64: 2, 32, 32>}, {pipeline_mode = #tpu.pipeline_mode<synchronous>, transform_indices = @transform_4, window_bounds = array<i64: 2, 1, 32>}, {pipeline_mode = #tpu.pipeline_mode<synchronous>, transform_indices = @transform_5, window_bounds = array<i64: 2, 1, 32>}, {pipeline_mode = #tpu.pipeline_mode<synchronous>, transform_indices = @transform_6, window_bounds = array<i64: 2, 1, 32>}, {pipeline_mode = #tpu.pipeline_mode<synchronous>, transform_indices = @transform_7, window_bounds = array<i64: 2, 32, 64>}, {pipeline_mode = #tpu.pipeline_mode<synchronous>, transform_indices = @transform_8, window_bounds = array<i64: 2, 1, 64>}, {pipeline_mode = #tpu.pipeline_mode<synchronous>, transform_indices = @transform_9, window_bounds = array<i64: 2, 64, 32>}, {pipeline_mode = #tpu.pipeline_mode<synchronous>, transform_indices = @transform_10, window_bounds = array<i64: 2, 1, 32>}, {pipeline_mode = #tpu.pipeline_mode<synchronous>, transform_indices = @transform_11, window_bounds = array<i64: 2, 1, 32>}, {pipeline_mode = #tpu.pipeline_mode<synchronous>, transform_indices = @transform_12, window_bounds = array<i64: 2, 1, 32>}, {transform_indices = @transform_13, window_bounds = array<i64: 16, 32>}]} {
    %c0_i32 = arith.constant 0 : i32
    %0 = arith.cmpi eq, %arg1, %c0_i32 : i32
    %1 = arith.extui %0 : i1 to i32
    %c0_i32_0 = arith.constant 0 : i32
    %2 = arith.cmpi ne, %1, %c0_i32_0 : i32
    scf.if %2 {
      %c0_53 = arith.constant 0 : index
      %c0_54 = arith.constant 0 : index
      %162 = vector.load %arg2[%c0_53, %c0_54] : memref<16x32xf32, #tpu.memory_space<vmem>>, vector<16x32xf32>
      %c0_55 = arith.constant 0 : index
      %c0_56 = arith.constant 0 : index
      %163 = vector.load %arg15[%c0_55, %c0_56] : memref<16x32xf32, #tpu.memory_space<vmem>>, vector<16x32xf32>
      tpu.vector_store %arg15[%c0_55, %c0_56], %162 {strides = array<i32>} : memref<16x32xf32, #tpu.memory_space<vmem>>, vector<16x32xf32>,
    } else {
    }
    %c0 = arith.constant 0 : index
    %c0_1 = arith.constant 0 : index
    %3 = vector.load %arg15[%c0, %c0_1] : memref<16x32xf32, #tpu.memory_space<vmem>>, vector<16x32xf32>
    %4 = arith.truncf %3 : vector<16x32xf32> to vector<16x32xbf16>
    %5 = arith.index_cast %arg1 : i32 to index
    %c0_2 = arith.constant 0 : index
    %c0_3 = arith.constant 0 : index
    %6 = vector.load %arg3[%5, %c0_2, %c0_3] : memref<2x32x96xbf16, #tpu.memory_space<vmem>>, vector<1x32x96xbf16>
    %7 = vector.shape_cast %6 : vector<1x32x96xbf16> to vector<32x96xbf16>
    %cst = arith.constant dense<0.000000e+00> : vector<16x96xf32>
    %8 = tpu.matmul %4, %7, %cst {dimension_numbers = #tpu.dot_dimension_numbers<[1], [0], [0], [1], [0, 0, 1, 1], [], []>} : vector<16x32xbf16>, vector<32x96xbf16>, vector<16x96xf32> -> vector<16x96xf32>
    %9 = arith.index_cast %arg1 : i32 to index
    %c0_4 = arith.constant 0 : index
    %c0_5 = arith.constant 0 : index
    %10 = vector.load %arg4[%9, %c0_4, %c0_5] : memref<2x1x96xf32, #tpu.memory_space<vmem>>, vector<1x1x96xf32>
    %11 = vector.shape_cast %10 : vector<1x1x96xf32> to vector<1x96xf32>
    %12 = vector.broadcast %11 : vector<1x96xf32> to vector<16x96xf32>
    %13 = arith.addf %8, %12 : vector<16x96xf32>
    %14 = vector.extract_strided_slice %13 {offsets = [0, 0], sizes = [16, 32], strides = [1, 1]} : vector<16x96xf32> to vector<16x32xf32>
    %cst_6 = arith.constant 2.500000e-01 : f32
    %15 = vector.broadcast %cst_6 : f32 to vector<16x32xf32>
    %16 = arith.mulf %14, %15 : vector<16x32xf32>
    %17 = arith.truncf %16 : vector<16x32xf32> to vector<16x32xbf16>
    %18 = vector.shape_cast %17 : vector<16x32xbf16> to vector<2x8x32xbf16>
    %19 = vector.extract_strided_slice %13 {offsets = [0, 32], sizes = [16, 32], strides = [1, 1]} : vector<16x96xf32> to vector<16x32xf32>
    %20 = arith.truncf %19 : vector<16x32xf32> to vector<16x32xbf16>
    %21 = vector.shape_cast %20 : vector<16x32xbf16> to vector<2x8x32xbf16>
    %22 = vector.extract_strided_slice %13 {offsets = [0, 64], sizes = [16, 32], strides = [1, 1]} : vector<16x96xf32> to vector<16x32xf32>
    %23 = arith.truncf %22 : vector<16x32xf32> to vector<16x32xbf16>
    %24 = vector.shape_cast %23 : vector<16x32xbf16> to vector<2x8x32xbf16>
    %25 = tpu.iota {dimensions = array<i32: 0>} : vector<8x8xi32>
    %26 = tpu.iota {dimensions = array<i32: 1>} : vector<8x8xi32>
    %27 = arith.cmpi sle, %26, %25 : vector<8x8xi32>
    %28 = vector.shape_cast %27 : vector<8x8xi1> to vector<1x8x8xi1>
    %29 = vector.extract_strided_slice %18 {offsets = [0, 0, 0], sizes = [2, 8, 16], strides = [1, 1, 1]} : vector<2x8x32xbf16> to vector<2x8x16xbf16>
    %30 = vector.extract_strided_slice %21 {offsets = [0, 0, 0], sizes = [2, 8, 16], strides = [1, 1, 1]} : vector<2x8x32xbf16> to vector<2x8x16xbf16>
    "tpu.trace_start"() <{level = 10 : i32, message = "bqd,bkd->bqk"}> : () -> ()
    %cst_7 = arith.constant dense<0.000000e+00> : vector<2x8x8xf32>
    %31 = tpu.matmul %29, %30, %cst_7 {dimension_numbers = #tpu.dot_dimension_numbers<[2], [2], [1], [1], [0, 0, 0, 1, 1, 1], [0], [0]>} : vector<2x8x16xbf16>, vector<2x8x16xbf16>, vector<2x8x8xf32> -> vector<2x8x8xf32>
    %cst_8 = arith.constant -1.000000e+30 : f32
    "tpu.trace_stop"() : () -> ()
    %32 = vector.shape_cast %28 : vector<1x8x8xi1> to vector<1x8x8xi1>
    %33 = vector.broadcast %32 : vector<1x8x8xi1> to vector<2x8x8xi1>
    %34 = vector.broadcast %cst_8 : f32 to vector<2x8x8xf32>
    %35 = arith.select %33, %31, %34 : vector<2x8x8xi1>, vector<2x8x8xf32>
    %cst_9 = arith.constant dense<0xFF800000> : vector<2x8xf32>
    %36 = vector.multi_reduction <maximumf>, %35, %cst_9 [2] : vector<2x8x8xf32> to vector<2x8xf32>
    %37 = vector.shape_cast %36 : vector<2x8xf32> to vector<2x8x1xf32>
    %38 = vector.broadcast %37 : vector<2x8x1xf32> to vector<2x8x8xf32>
    %39 = arith.subf %35, %38 : vector<2x8x8xf32>
    %40 = math.exp %39 : vector<2x8x8xf32>
    %cst_10 = arith.constant dense<0.000000e+00> : vector<2x8xf32>
    %41 = vector.multi_reduction <add>, %40, %cst_10 [2] : vector<2x8x8xf32> to vector<2x8xf32>
    %42 = vector.shape_cast %41 : vector<2x8xf32> to vector<2x8x1xf32>
    %43 = tpu.reciprocal %42 {approx = true} : vector<2x8x1xf32> -> vector<2x8x1xf32>
    %44 = vector.broadcast %43 : vector<2x8x1xf32> to vector<2x8x8xf32>
    %45 = arith.mulf %40, %44 : vector<2x8x8xf32>
    %46 = arith.truncf %45 : vector<2x8x8xf32> to vector<2x8x8xbf16>
    %47 = vector.extract_strided_slice %24 {offsets = [0, 0, 0], sizes = [2, 8, 16], strides = [1, 1, 1]} : vector<2x8x32xbf16> to vector<2x8x16xbf16>
    "tpu.trace_start"() <{level = 10 : i32, message = "bqk,bkd->bqd"}> : () -> ()
    %cst_11 = arith.constant dense<0.000000e+00> : vector<2x8x16xf32>
    %48 = tpu.matmul %46, %47, %cst_11 {dimension_numbers = #tpu.dot_dimension_numbers<[2], [1], [1], [2], [0, 0, 0, 1, 1, 2], [0], [0]>} : vector<2x8x8xbf16>, vector<2x8x16xbf16>, vector<2x8x16xf32> -> vector<2x8x16xf32>
    "tpu.trace_stop"() : () -> ()
    %49 = vector.extract_strided_slice %18 {offsets = [0, 0, 16], sizes = [2, 8, 16], strides = [1, 1, 1]} : vector<2x8x32xbf16> to vector<2x8x16xbf16>
    %50 = vector.extract_strided_slice %21 {offsets = [0, 0, 16], sizes = [2, 8, 16], strides = [1, 1, 1]} : vector<2x8x32xbf16> to vector<2x8x16xbf16>
    "tpu.trace_start"() <{level = 10 : i32, message = "bqd,bkd->bqk"}> : () -> ()
    %cst_12 = arith.constant dense<0.000000e+00> : vector<2x8x8xf32>
    %51 = tpu.matmul %49, %50, %cst_12 {dimension_numbers = #tpu.dot_dimension_numbers<[2], [2], [1], [1], [0, 0, 0, 1, 1, 1], [0], [0]>} : vector<2x8x16xbf16>, vector<2x8x16xbf16>, vector<2x8x8xf32> -> vector<2x8x8xf32>
    %cst_13 = arith.constant -1.000000e+30 : f32
    "tpu.trace_stop"() : () -> ()
    %52 = vector.shape_cast %28 : vector<1x8x8xi1> to vector<1x8x8xi1>
    %53 = vector.broadcast %52 : vector<1x8x8xi1> to vector<2x8x8xi1>
    %54 = vector.broadcast %cst_13 : f32 to vector<2x8x8xf32>
    %55 = arith.select %53, %51, %54 : vector<2x8x8xi1>, vector<2x8x8xf32>
    %cst_14 = arith.constant dense<0xFF800000> : vector<2x8xf32>
    %56 = vector.multi_reduction <maximumf>, %55, %cst_14 [2] : vector<2x8x8xf32> to vector<2x8xf32>
    %57 = vector.shape_cast %56 : vector<2x8xf32> to vector<2x8x1xf32>
    %58 = vector.broadcast %57 : vector<2x8x1xf32> to vector<2x8x8xf32>
    %59 = arith.subf %55, %58 : vector<2x8x8xf32>
    %60 = math.exp %59 : vector<2x8x8xf32>
    %cst_15 = arith.constant dense<0.000000e+00> : vector<2x8xf32>
    %61 = vector.multi_reduction <add>, %60, %cst_15 [2] : vector<2x8x8xf32> to vector<2x8xf32>
    %62 = vector.shape_cast %61 : vector<2x8xf32> to vector<2x8x1xf32>
    %63 = tpu.reciprocal %62 {approx = true} : vector<2x8x1xf32> -> vector<2x8x1xf32>
    %64 = vector.broadcast %63 : vector<2x8x1xf32> to vector<2x8x8xf32>
    %65 = arith.mulf %60, %64 : vector<2x8x8xf32>
    %66 = arith.truncf %65 : vector<2x8x8xf32> to vector<2x8x8xbf16>
    %67 = vector.extract_strided_slice %24 {offsets = [0, 0, 16], sizes = [2, 8, 16], strides = [1, 1, 1]} : vector<2x8x32xbf16> to vector<2x8x16xbf16>
    "tpu.trace_start"() <{level = 10 : i32, message = "bqk,bkd->bqd"}> : () -> ()
    %cst_16 = arith.constant dense<0.000000e+00> : vector<2x8x16xf32>
    %68 = tpu.matmul %66, %67, %cst_16 {dimension_numbers = #tpu.dot_dimension_numbers<[2], [1], [1], [2], [0, 0, 0, 1, 1, 2], [0], [0]>} : vector<2x8x8xbf16>, vector<2x8x16xbf16>, vector<2x8x16xf32> -> vector<2x8x16xf32>
    "tpu.trace_stop"() : () -> ()
    %69 = tpu.concatenate %48, %68 in 2 : vector<2x8x16xf32>, vector<2x8x16xf32> -> vector<2x8x32xf32>
    %70 = vector.shape_cast %69 : vector<2x8x32xf32> to vector<16x32xf32>
    %71 = arith.truncf %70 : vector<16x32xf32> to vector<16x32xbf16>
    %72 = arith.index_cast %arg1 : i32 to index
    %c0_17 = arith.constant 0 : index
    %c0_18 = arith.constant 0 : index
    %73 = vector.load %arg5[%72, %c0_17, %c0_18] : memref<2x32x32xbf16, #tpu.memory_space<vmem>>, vector<1x32x32xbf16>
    %74 = vector.shape_cast %73 : vector<1x32x32xbf16> to vector<32x32xbf16>
    %cst_19 = arith.constant dense<0.000000e+00> : vector<16x32xf32>
    %75 = tpu.matmul %71, %74, %cst_19 {dimension_numbers = #tpu.dot_dimension_numbers<[1], [0], [0], [1], [0, 0, 1, 1], [], []>} : vector<16x32xbf16>, vector<32x32xbf16>, vector<16x32xf32> -> vector<16x32xf32>
    %76 = arith.index_cast %arg1 : i32 to index
    %c0_20 = arith.constant 0 : index
    %c0_21 = arith.constant 0 : index
    %77 = vector.load %arg6[%76, %c0_20, %c0_21] : memref<2x1x32xf32, #tpu.memory_space<vmem>>, vector<1x1x32xf32>
    %78 = vector.shape_cast %77 : vector<1x1x32xf32> to vector<1x32xf32>
    %79 = vector.broadcast %78 : vector<1x32xf32> to vector<16x32xf32>
    %80 = arith.addf %75, %79 : vector<16x32xf32>
    %81 = arith.addf %3, %80 : vector<16x32xf32>
    %cst_22 = arith.constant dense<0.000000e+00> : vector<16xf32>
    %82 = vector.multi_reduction <add>, %81, %cst_22 [1] : vector<16x32xf32> to vector<16xf32>
    %83 = vector.shape_cast %82 : vector<16xf32> to vector<16x1xf32>
    %cst_23 = arith.constant 3.200000e+01 : f32
    %84 = vector.broadcast %cst_23 : f32 to vector<16x1xf32>
    %85 = arith.divf %83, %84 : vector<16x1xf32>
    %86 = vector.broadcast %85 : vector<16x1xf32> to vector<16x32xf32>
    %87 = arith.subf %81, %86 : vector<16x32xf32>
    %88 = arith.mulf %87, %87 : vector<16x32xf32>
    %cst_24 = arith.constant dense<0.000000e+00> : vector<16xf32>
    %89 = vector.multi_reduction <add>, %88, %cst_24 [1] : vector<16x32xf32> to vector<16xf32>
    %90 = vector.shape_cast %89 : vector<16xf32> to vector<16x1xf32>
    %cst_25 = arith.constant 3.200000e+01 : f32
    %91 = vector.broadcast %cst_25 : f32 to vector<16x1xf32>
    %92 = arith.divf %90, %91 : vector<16x1xf32>
    %93 = vector.broadcast %85 : vector<16x1xf32> to vector<16x32xf32>
    %94 = arith.subf %81, %93 : vector<16x32xf32>
    %cst_26 = arith.constant 9.99999974E-6 : f32
    %95 = vector.broadcast %cst_26 : f32 to vector<16x1xf32>
    %96 = arith.addf %92, %95 : vector<16x1xf32>
    %97 = math.rsqrt %96 : vector<16x1xf32>
    %98 = vector.broadcast %97 : vector<16x1xf32> to vector<16x32xf32>
    %99 = arith.mulf %94, %98 : vector<16x32xf32>
    %100 = arith.index_cast %arg1 : i32 to index
    %c0_27 = arith.constant 0 : index
    %c0_28 = arith.constant 0 : index
    %101 = vector.load %arg7[%100, %c0_27, %c0_28] : memref<2x1x32xf32, #tpu.memory_space<vmem>>, vector<1x1x32xf32>
    %102 = vector.shape_cast %101 : vector<1x1x32xf32> to vector<1x32xf32>
    %103 = vector.broadcast %102 : vector<1x32xf32> to vector<16x32xf32>
    %104 = arith.mulf %99, %103 : vector<16x32xf32>
    %105 = arith.index_cast %arg1 : i32 to index
    %c0_29 = arith.constant 0 : index
    %c0_30 = arith.constant 0 : index
    %106 = vector.load %arg8[%105, %c0_29, %c0_30] : memref<2x1x32xf32, #tpu.memory_space<vmem>>, vector<1x1x32xf32>
    %107 = vector.shape_cast %106 : vector<1x1x32xf32> to vector<1x32xf32>
    %108 = vector.broadcast %107 : vector<1x32xf32> to vector<16x32xf32>
    %109 = arith.addf %104, %108 : vector<16x32xf32>
    %110 = arith.truncf %109 : vector<16x32xf32> to vector<16x32xbf16>
    %111 = arith.index_cast %arg1 : i32 to index
    %c0_31 = arith.constant 0 : index
    %c0_32 = arith.constant 0 : index
    %112 = vector.load %arg9[%111, %c0_31, %c0_32] : memref<2x32x64xbf16, #tpu.memory_space<vmem>>, vector<1x32x64xbf16>
    %113 = vector.shape_cast %112 : vector<1x32x64xbf16> to vector<32x64xbf16>
    %cst_33 = arith.constant dense<0.000000e+00> : vector<16x64xf32>
    %114 = tpu.matmul %110, %113, %cst_33 {dimension_numbers = #tpu.dot_dimension_numbers<[1], [0], [0], [1], [0, 0, 1, 1], [], []>} : vector<16x32xbf16>, vector<32x64xbf16>, vector<16x64xf32> -> vector<16x64xf32>
    %115 = arith.index_cast %arg1 : i32 to index
    %c0_34 = arith.constant 0 : index
    %c0_35 = arith.constant 0 : index
    %116 = vector.load %arg10[%115, %c0_34, %c0_35] : memref<2x1x64xf32, #tpu.memory_space<vmem>>, vector<1x1x64xf32>
    %117 = vector.shape_cast %116 : vector<1x1x64xf32> to vector<1x64xf32>
    %118 = vector.broadcast %117 : vector<1x64xf32> to vector<16x64xf32>
    %119 = arith.addf %114, %118 : vector<16x64xf32>
    %cst_36 = arith.constant 0.000000e+00 : f32
    %120 = vector.broadcast %cst_36 : f32 to vector<16x64xf32>
    %121 = arith.maximumf %119, %120 : vector<16x64xf32>
    %122 = arith.truncf %121 : vector<16x64xf32> to vector<16x64xbf16>
    %123 = arith.index_cast %arg1 : i32 to index
    %c0_37 = arith.constant 0 : index
    %c0_38 = arith.constant 0 : index
    %124 = vector.load %arg11[%123, %c0_37, %c0_38] : memref<2x64x32xbf16, #tpu.memory_space<vmem>>, vector<1x64x32xbf16>
    %125 = vector.shape_cast %124 : vector<1x64x32xbf16> to vector<64x32xbf16>
    %cst_39 = arith.constant dense<0.000000e+00> : vector<16x32xf32>
    %126 = tpu.matmul %122, %125, %cst_39 {dimension_numbers = #tpu.dot_dimension_numbers<[1], [0], [0], [1], [0, 0, 1, 1], [], []>} : vector<16x64xbf16>, vector<64x32xbf16>, vector<16x32xf32> -> vector<16x32xf32>
    %127 = arith.index_cast %arg1 : i32 to index
    %c0_40 = arith.constant 0 : index
    %c0_41 = arith.constant 0 : index
    %128 = vector.load %arg12[%127, %c0_40, %c0_41] : memref<2x1x32xf32, #tpu.memory_space<vmem>>, vector<1x1x32xf32>
    %129 = vector.shape_cast %128 : vector<1x1x32xf32> to vector<1x32xf32>
    %130 = vector.broadcast %129 : vector<1x32xf32> to vector<16x32xf32>
    %131 = arith.addf %126, %130 : vector<16x32xf32>
    %132 = arith.addf %109, %131 : vector<16x32xf32>
    %cst_42 = arith.constant dense<0.000000e+00> : vector<16xf32>
    %133 = vector.multi_reduction <add>, %132, %cst_42 [1] : vector<16x32xf32> to vector<16xf32>
    %134 = vector.shape_cast %133 : vector<16xf32> to vector<16x1xf32>
    %cst_43 = arith.constant 3.200000e+01 : f32
    %135 = vector.broadcast %cst_43 : f32 to vector<16x1xf32>
    %136 = arith.divf %134, %135 : vector<16x1xf32>
    %137 = vector.broadcast %136 : vector<16x1xf32> to vector<16x32xf32>
    %138 = arith.subf %132, %137 : vector<16x32xf32>
    %139 = arith.mulf %138, %138 : vector<16x32xf32>
    %cst_44 = arith.constant dense<0.000000e+00> : vector<16xf32>
    %140 = vector.multi_reduction <add>, %139, %cst_44 [1] : vector<16x32xf32> to vector<16xf32>
    %141 = vector.shape_cast %140 : vector<16xf32> to vector<16x1xf32>
    %cst_45 = arith.constant 3.200000e+01 : f32
    %142 = vector.broadcast %cst_45 : f32 to vector<16x1xf32>
    %143 = arith.divf %141, %142 : vector<16x1xf32>
    %144 = vector.broadcast %136 : vector<16x1xf32> to vector<16x32xf32>
    %145 = arith.subf %132, %144 : vector<16x32xf32>
    %cst_46 = arith.constant 9.99999974E-6 : f32
    %146 = vector.broadcast %cst_46 : f32 to vector<16x1xf32>
    %147 = arith.addf %143, %146 : vector<16x1xf32>
    %148 = math.rsqrt %147 : vector<16x1xf32>
    %149 = vector.broadcast %148 : vector<16x1xf32> to vector<16x32xf32>
    %150 = arith.mulf %145, %149 : vector<16x32xf32>
    %151 = arith.index_cast %arg1 : i32 to index
    %c0_47 = arith.constant 0 : index
    %c0_48 = arith.constant 0 : index
    %152 = vector.load %arg13[%151, %c0_47, %c0_48] : memref<2x1x32xf32, #tpu.memory_space<vmem>>, vector<1x1x32xf32>
    %153 = vector.shape_cast %152 : vector<1x1x32xf32> to vector<1x32xf32>
    %154 = vector.broadcast %153 : vector<1x32xf32> to vector<16x32xf32>
    %155 = arith.mulf %150, %154 : vector<16x32xf32>
    %156 = arith.index_cast %arg1 : i32 to index
    %c0_49 = arith.constant 0 : index
    %c0_50 = arith.constant 0 : index
    %157 = vector.load %arg14[%156, %c0_49, %c0_50] : memref<2x1x32xf32, #tpu.memory_space<vmem>>, vector<1x1x32xf32>
    %158 = vector.shape_cast %157 : vector<1x1x32xf32> to vector<1x32xf32>
    %159 = vector.broadcast %158 : vector<1x32xf32> to vector<16x32xf32>
    %160 = arith.addf %155, %159 : vector<16x32xf32>
    %c0_51 = arith.constant 0 : index
    %c0_52 = arith.constant 0 : index
    %161 = vector.load %arg15[%c0_51, %c0_52] : memref<16x32xf32, #tpu.memory_space<vmem>>, vector<16x32xf32>
    tpu.vector_store %arg15[%c0_51, %c0_52], %160 {strides = array<i32>} : memref<16x32xf32, #tpu.memory_space<vmem>>, vector<16x32xf32>,
    return
  }
  func.func @transform_0(%arg0: i32, %arg1: i32) -> (i32, i32) {
    %c0_i32 = arith.constant 0 : i32
    %c0_i32_0 = arith.constant 0 : i32
    return %arg0, %c0_i32 : i32, i32
  }
  func.func @transform_1(%arg0: i32, %arg1: i32) -> (i32, i32, i32) {
    %c0_i32 = arith.constant 0 : i32
    %c0_i32_0 = arith.constant 0 : i32
    %c0_i32_1 = arith.constant 0 : i32
    %c0_i32_2 = arith.constant 0 : i32
    return %c0_i32, %c0_i32_0, %c0_i32_1 : i32, i32, i32
  }
  func.func @transform_2(%arg0: i32, %arg1: i32) -> (i32, i32, i32) {
    %c0_i32 = arith.constant 0 : i32
    %c0_i32_0 = arith.constant 0 : i32
    %c0_i32_1 = arith.constant 0 : i32
    %c0_i32_2 = arith.constant 0 : i32
    return %c0_i32, %c0_i32_0, %c0_i32_1 : i32, i32, i32
  }
  func.func @transform_3(%arg0: i32, %arg1: i32) -> (i32, i32, i32) {
    %c0_i32 = arith.constant 0 : i32
    %c0_i32_0 = arith.constant 0 : i32
    %c0_i32_1 = arith.constant 0 : i32
    %c0_i32_2 = arith.constant 0 : i32
    return %c0_i32, %c0_i32_0, %c0_i32_1 : i32, i32, i32
  }
  func.func @transform_4(%arg0: i32, %arg1: i32) -> (i32, i32, i32) {
    %c0_i32 = arith.constant 0 : i32
    %c0_i32_0 = arith.constant 0 : i32
    %c0_i32_1 = arith.constant 0 : i32
    %c0_i32_2 = arith.constant 0 : i32
    return %c0_i32, %c0_i32_0, %c0_i32_1 : i32, i32, i32
  }
  func.func @transform_5(%arg0: i32, %arg1: i32) -> (i32, i32, i32) {
    %c0_i32 = arith.constant 0 : i32
    %c0_i32_0 = arith.constant 0 : i32
    %c0_i32_1 = arith.constant 0 : i32
    %c0_i32_2 = arith.constant 0 : i32
    return %c0_i32, %c0_i32_0, %c0_i32_1 : i32, i32, i32
  }
  func.func @transform_6(%arg0: i32, %arg1: i32) -> (i32, i32, i32) {
    %c0_i32 = arith.constant 0 : i32
    %c0_i32_0 = arith.constant 0 : i32
    %c0_i32_1 = arith.constant 0 : i32
    %c0_i32_2 = arith.constant 0 : i32
    return %c0_i32, %c0_i32_0, %c0_i32_1 : i32, i32, i32
  }
  func.func @transform_7(%arg0: i32, %arg1: i32) -> (i32, i32, i32) {
    %c0_i32 = arith.constant 0 : i32
    %c0_i32_0 = arith.constant 0 : i32
    %c0_i32_1 = arith.constant 0 : i32
    %c0_i32_2 = arith.constant 0 : i32
    return %c0_i32, %c0_i32_0, %c0_i32_1 : i32, i32, i32
  }
  func.func @transform_8(%arg0: i32, %arg1: i32) -> (i32, i32, i32) {
    %c0_i32 = arith.constant 0 : i32
    %c0_i32_0 = arith.constant 0 : i32
    %c0_i32_1 = arith.constant 0 : i32
    %c0_i32_2 = arith.constant 0 : i32
    return %c0_i32, %c0_i32_0, %c0_i32_1 : i32, i32, i32
  }
  func.func @transform_9(%arg0: i32, %arg1: i32) -> (i32, i32, i32) {
    %c0_i32 = arith.constant 0 : i32
    %c0_i32_0 = arith.constant 0 : i32
    %c0_i32_1 = arith.constant 0 : i32
    %c0_i32_2 = arith.constant 0 : i32
    return %c0_i32, %c0_i32_0, %c0_i32_1 : i32, i32, i32
  }
  func.func @transform_10(%arg0: i32, %arg1: i32) -> (i32, i32, i32) {
    %c0_i32 = arith.constant 0 : i32
    %c0_i32_0 = arith.constant 0 : i32
    %c0_i32_1 = arith.constant 0 : i32
    %c0_i32_2 = arith.constant 0 : i32
    return %c0_i32, %c0_i32_0, %c0_i32_1 : i32, i32, i32
  }
  func.func @transform_11(%arg0: i32, %arg1: i32) -> (i32, i32, i32) {
    %c0_i32 = arith.constant 0 : i32
    %c0_i32_0 = arith.constant 0 : i32
    %c0_i32_1 = arith.constant 0 : i32
    %c0_i32_2 = arith.constant 0 : i32
    return %c0_i32, %c0_i32_0, %c0_i32_1 : i32, i32, i32
  }
  func.func @transform_12(%arg0: i32, %arg1: i32) -> (i32, i32, i32) {
    %c0_i32 = arith.constant 0 : i32
    %c0_i32_0 = arith.constant 0 : i32
    %c0_i32_1 = arith.constant 0 : i32
    %c0_i32_2 = arith.constant 0 : i32
    return %c0_i32, %c0_i32_0, %c0_i32_1 : i32, i32, i32
  }
  func.func @transform_13(%arg0: i32, %arg1: i32) -> (i32, i32) {
    %c0_i32 = arith.constant 0 : i32
    %c0_i32_0 = arith.constant 0 : i32
    return %arg0, %c0_i32 : i32, i32
  }
}

</mosaic_0001>

<bundles_post_ra>
// kernel: transformer_forward.3
= control target key start
LH: loop header
LB: loop body
LE: loop exit
PB: predicated region body
PF: predicated region fallthrough
CT: control target
= control target key end

     0   :  { %v111_v0 = vmov 0.0   ;;  %vm112_vm0 = vmmov 0   ;;  %vm41_vm1 = vcmask 261120   ;;  %s154_s1 = inlined_call_operand.vmem [shape: bf16[32,128], index: 1, kind: input, shape index: {}]   ;;  %s155_s0 = inlined_call_operand.vmem [shape: f32[16,32], index: 0, kind: input, shape index: {}]   ;;  %s156_s2 = inlined_call_operand.vmem [shape: f32[1,128], index: 2, kind: input, shape index: {}]   ;;  %s157_s3 = inlined_call_operand.vmem [shape: f32[16,128], index: 3, kind: output, shape index: {}]  }
   0x1   :  { %99 = vmatprep.subr.bf16.mxu0 %v111_v0  ;;  %v109_v1 = vld [vmem:[%s154_s1] sm:$0xff]   ;;  %103 = vmatprep.mubr.msk.bf16.mxu0 %vm112_vm0, %v111_v0  ;;  %v110_v2 = vld [vmem:[%s154_s1 + $0x8] sm:$0xff]  }
   0x2   :  { %100 = vmatpush3.bf16.msra.mxu0 %v109_v1  ;;  %v15_v3 = vld [vmem:[%s155_s0] sm:$0xff]  ;;  %v16_v4 = vld [vmem:[%s155_s0 + $0x8] sm:$0xff] }
   0x3   :  { %101 = vmatprep.subr.bf16.mxu0 %v111_v0  ;;  %v17_v5 = vpack.c.bf16 %v16_v4, %v15_v3  ;;  %v92_v6 = vld [vmem:[%s156_s2] ss:$0 sm:$0xff] }
   0x6   :  { %102 = vmatpush3.bf16.msra.mxu0 %v110_v2 }
   0x9   :  { %104 = vmatmul.mubr.msk.bf16.vlgmr.msra.gmra.mrb[0].mxu0 %vm41_vm1, %v17_v5 }
  0xdc   :  { %v79_v7 = vpop.f32.mrb[0].mxu0 }
  0xdd   :  { %v80_v8 = vadd.f32 %v92_v6, %v79_v7  ;;  %v105_v9 = vpop.f32.mrb[1].mxu0 }
  0xde   :  { %v82_v10 = vpop.f32.mrb[2].mxu0 }
  0xdf   :  { %86 = vst [vmem:[%s157_s3] sm:$0xff] %v80_v8  ;;  %v83_v11 = vadd.f32 %v92_v6, %v82_v10  ;;  %v106_v12 = vpop.f32.mrb[3].mxu0 }
  0xe1   :  { %87 = vst [vmem:[%s157_s3 + $0x8] sm:$0xff] %v83_v11 }

// kernel: transformer_forward.2
= control target key start
LH: loop header
LB: loop body
LE: loop exit
PB: predicated region body
PF: predicated region fallthrough
CT: control target
= control target key end

     0   :  { %s1772_s25 = smov 0   ;;  %s1774_s26 = smov 0   ;;  %s2011_s0 = inlined_call_operand.vmem [shape: f32[16,32], index: 0, kind: input, shape index: {}]   ;;  %s2012_s1 = inlined_call_operand.vmem [shape: bf16[2,32,96], index: 1, kind: input, shape index: {}]   ;;  %s2013_s2 = inlined_call_operand.vmem [shape: f32[2,1,96], index: 2, kind: input, shape index: {}]   ;;  %s2014_s3 = inlined_call_operand.vmem [shape: bf16[2,32,32], index: 3, kind: input, shape index: {}]   ;;  %s2015_s4 = inlined_call_operand.vmem [shape: f32[2,1,32], index: 4, kind: input, shape index: {}]   ;;  %s2016_s5 = inlined_call_operand.vmem [shape: f32[2,1,32], index: 5, kind: input, shape index: {}]   ;;  %s2017_s6 = inlined_call_operand.vmem [shape: f32[2,1,32], index: 6, kind: input, shape index: {}]   ;;  %s2018_s7 = inlined_call_operand.vmem [shape: bf16[2,32,64], index: 7, kind: input, shape index: {}]   ;;  %s2019_s8 = inlined_call_operand.vmem [shape: f32[2,1,64], index: 8, kind: input, shape index: {}]   ;;  %s2020_s9 = inlined_call_operand.vmem [shape: bf16[2,64,32], index: 9, kind: input, shape index: {}]   ;;  %s2021_s10 = inlined_call_operand.vmem [shape: f32[2,1,32], index: 10, kind: input, shape index: {}]   ;;  %s2022_s11 = inlined_call_operand.vmem [shape: f32[2,1,32], index: 11, kind: input, shape index: {}]   ;;  %s2023_s12 = inlined_call_operand.vmem [shape: f32[2,1,32], index: 12, kind: input, shape index: {}]   ;;  %s2024_s13 = inlined_call_operand.vmem [shape: f32[16,32], index: 13, kind: output, shape index: {}]  }
   0x1   :  { %s1776_s27 = smov 0  }
   0x2 LB: > { %s32_s28 = sadd.s32 1, %s1688_s26  ;;  %p1431_p0 = scmp.ge.s32.totalorder %s1692_s27, 1  ;;  %s1692_s27 = sphi %s1776_s27, %s23_s27   ;;  %s1688_s26 = sphi %s1774_s26, %s2026_s26   ;;  %s1684_s25 = sphi %s1772_s25, %s2025_s25  }
   0x3   : > { %p33_p1 = scmp.ge.s32.totalorder %s32_s28, 2  ;;  %p400_p2 = scmp.lt.s32.totalorder %s1692_s27, 3 }
   0x5   : > { %s2028_s28 = smov (%p33_p1, %s32_s28), 0  ;;  %p401_p3 = pnand %p1431_p0, %p400_p2 }
   0x6   : > { %p1432_p4 = scmp.ne.s32.totalorder (!%p401_p3), %s1684_s25, 0 }
   0x7   : > { %404 = sbr.rel (%p401_p3) target bundleno = 3059 (0xbf3), region = 72 }
   0xe   : > { %460 = sbr.rel (%p1432_p4) target bundleno = 21 (0x15), region = 76  ;;  %v461_v0 = vld [vmem:[%s2011_s0] sm:$0xff] (!%p1432_p4)  ;;  %vm463_vm0 = vcmask (!%p1432_p4), 261120   ;;  %v462_v1 = vld [vmem:[%s2011_s0 + $0x8] sm:$0xff] (!%p1432_p4) }
   0xf   : > { %464 = vst.msk [vmem:[%s2024_s13] sm:$0xff] (!%p1432_p4), %vm463_vm0, %v461_v0  ;;  %465 = vst.msk [vmem:[%s2024_s13 + $0x8] sm:$0xff] (!%p1432_p4), %vm463_vm0, %v462_v1 }
  0x15 PF: > { %s1477_s20 = sshll.u32 %s1684_s25, 4  ;;  %v1694_v2 = vmov 0.0   ;;  %vm1695_vm1 = vmmov 0   ;;  %vm496_vm2 = vcmask 261120   ;;  %s476_s24 = scalar_lea.vmem %s2013_s2, %s1684_s25  ;;  %vm561_vm3 = vcmask 130048  }
  0x16   : > { %1515 = vmatprep.subr.bf16.mxu0 %v1694_v2  ;;  %s471_s23 = scalar_lea.vmem %s2012_s1, %s1477_s20  ;;  %1519 = vmatprep.mubr.msk.bf16.mxu0 %vm1695_vm1, %v1694_v2  ;;  %v1815_v4 = vld [vmem:[%s2024_s13] sm:$0xff]  ;;  %v1820_v5 = vld [vmem:[%s2024_s13 + $0x8] sm:$0xff]  ;;  %s1828_s17 = scalar_lea.vmem %s2014_s3, %s1477_s20  ;;  %v553_v25 = vlaneseq  ;;  %vm661_vm5 = vcmask 64512   ;;  %vm691_vm6 = vcmask 1043456   ;;  %vm1252_vm7 = vcmask 523264  }
  0x17   : > { %v1636_v3 = vld [vmem:[%s471_s23] sm:$0xff]   ;;  %1523 = vmatprep.subr.bf16.mxu1 %v1694_v2  ;;  %1525 = vmatprep.mubr.msk.bf16.mxu1 %vm1695_vm1, %v1694_v2  ;;  %v1637_v6 = vld [vmem:[%s471_s23 + $0x8] sm:$0xff]   ;;  %s1833_s21 = scalar_lea.vmem %s2018_s7, %s1477_s20  ;;  %v468_v7 = vpack.c.bf16 %v1820_v5, %v1815_v4  ;;  %s1696_s20 = smov 96  }
  0x18   : > { %1516 = vmatpush3.bf16.msra.mxu0 %v1636_v3  ;;  %v1435_v8 = vld [vmem:[%s476_s24] ss:$0 sm:$0xff]  ;;  %v1862_v26 = vshrl.u32 %v553_v25, 7  ;;  %v1864_v27 = vand.u32 127, %v553_v25  ;;  %s1697_s29 = smov 64   ;;  %s1698_s30 = smov 80  }
  0x19   : > { %1517 = vmatprep.subr.bf16.mxu0 %v1694_v2  ;;  %s1699_s14 = smov 112   ;;  %s1700_s15 = smov 48  }
  0x1a   : > { %vm557_vm4 = vcmp.le.s32.totalorder %v1864_v27, %v1862_v26  ;;  %s1701_s16 = smov 16   ;;  %s1022_s19 = scalar_lea.vmem %s2015_s4, %s1684_s25 }
  0x1b   : > { %s1484_s22 = sshll.u32 %s1684_s25, 5  ;;  %s1220_s24 = scalar_lea.vmem %s2021_s10, %s1684_s25 }
  0x1c   : > { %1518 = vmatpush3.bf16.msra.mxu0 %v1637_v6 }
  0x1d   : > { %1529 = vmatprep.subr.bf16.mxu0 %v1694_v2 }
  0x1f   : > { %1520 = vmatmul.mubr.msk.bf16.vlgmr.msra.gmra.mrb[0].mxu0 %vm496_vm2, %v468_v7 }
  0x20   : > { %1531 = vmatprep.mubr.msk.bf16.mxu0 %vm1695_vm1, %v1694_v2 }
  0xf2   : > { %v534_v9 = vpop.f32.mrb[0].mxu0 }
  0xf3   : > { %v535_v10 = vadd.f32 %v1435_v8, %v534_v9  ;;  %v1521_v11 = vpop.f32.mrb[1].mxu0 }
  0xf4   : > { %v537_v12 = vpop.f32.mrb[2].mxu0 }
  0xf5   : > { %v1846_v13 = vpack.c.bf16 %v535_v10, %v535_v10  ;;  %v538_v14 = vadd.f32 %v1435_v8, %v537_v12  ;;  %v1522_v15 = vpop.f32.mrb[3].mxu0  ;;  %v541_v19 = vmul.f32 0.25, %v535_v10 }
  0xf7   : > { %559 = vrot.lane.b32.xlu0 %v1846_v13, %s1696_s20  ;;  %v1849_v16 = vpack.c.bf16 %v538_v14, %v538_v14  ;;  %v1478_v22 = vpack.c.bf16 %v541_v19, %v541_v19  ;;  %v542_v23 = vmul.f32 0.25, %v538_v14 }
  0xf9   : > { %v1479_v24 = vpack.c.bf16 %v542_v23, %v542_v23 }
  0xfb   : > { %609 = vrot.lane.b32.xlu0 %v1849_v16, %s1696_s20  ;;  %s1956_s20 = scalar_lea.vmem %s2020_s9, %s1484_s22 }
 0x169   : > { %v560_v17 = vpop.permute.xlu0 %559 }
 0x16a   : > { %v566_v18 = vsel %vm561_vm3, %v560_v17, 0 }
 0x16b   : > { %1524 = vmatpush3.bf16.xpose.msra.mxu1 %v566_v18 }
 0x16c   : > { %1535 = vmatprep.subr.bf16.mxu1 %v1694_v2 }
 0x16d   : > { %v610_v20 = vpop.permute.xlu0 %609 }
 0x16e   : > { %v615_v21 = vsel %vm561_vm3, %v610_v20, 0 }
 0x16f   : > { %1530 = vmatpush3.bf16.xpose.msra.mxu0 %v615_v21 }
 0x170   : > { %1541 = vmatprep.subr.bf16.mxu0 %v1694_v2 }
 0x172   : > { %1526 = vmatmul.mubr.msk.bf16.vlgmr.msra.gmra.mrb[0].mxu1 %vm561_vm3, %v1478_v22 }
 0x173   : > { %1537 = vmatprep.mubr.msk.bf16.mxu1 %vm1695_vm1, %v1694_v2 }
 0x176   : > { %1532 = vmatmul.mubr.msk.bf16.vlgmr.msra.gmra.mrb[4].mxu0 %vm561_vm3, %v1479_v24 }
 0x177   : > { %1543 = vmatprep.mubr.msk.bf16.mxu0 %vm1695_vm1, %v1694_v2 }
 0x245   : > { %v602_v28 = vpop.f32.mrb[0].mxu1 }
 0x246   : > { %v659_v29 = vsel %vm557_vm4, %v602_v28, -1e+30  ;;  %v1527_v30 = vpop.f32.mrb[1].mxu1 }
 0x247   : > { %v605_v31 = vpop.f32.mrb[2].mxu1  ;;  %v662_v32 = vsel %vm661_vm5, %v659_v29, -inf }
 0x248   : > { %663 = vmax.xlane.f32.xlu1 %v662_v32  ;;  %v1528_v33 = vpop.f32.mrb[3].mxu1 }
 0x249   : > { %v651_v34 = vpop.f32.mrb[4].mxu0 }
 0x24a   : > { %v660_v35 = vsel %vm557_vm4, %v651_v34, -1e+30  ;;  %v1533_v36 = vpop.f32.mrb[5].mxu0 }
 0x24b   : > { %v654_v37 = vpop.f32.mrb[6].mxu0  ;;  %v665_v38 = vsel %vm661_vm5, %v660_v35, -inf }
 0x24c   : > { %666 = vmax.xlane.f32.xlu1 %v665_v38  ;;  %v1534_v39 = vpop.f32.mrb[7].mxu0 }
 0x25d   : > { %686 = vrot.lane.b32.xlu1 %v1846_v13, %s1697_s29 }
 0x261   : > { %735 = vrot.lane.b32.xlu1 %v1849_v16, %s1697_s29  ;;  %s1325_s29 = scalar_lea.vmem %s2022_s11, %s1684_s25 }
 0x265   : > { %785 = vrot.lane.b32.xlu1 %v1846_v13, %s1698_s30 }
 0x2d5   : > { %v664_v40 = vpop.xlane.xlu1 %663 }
 0x2d6   : > { %v668_v41 = vsub.f32 %v659_v29, %v664_v40 }
 0x2d8   : > { %v670_v42 = vmul.f32 1.442695, %v668_v41 }
 0x2d9   : > { %v667_v43 = vpop.xlane.xlu1 %666 }
 0x2da   : > { %1646 = vpow2.f32 %v670_v42  ;;  %v669_v44 = vsub.f32 %v660_v35, %v667_v43 }
 0x2dc   : > { %v672_v45 = vmul.f32 1.442695, %v669_v44 }
 0x2dd   : > { %v687_v46 = vpop.permute.xlu1 %686 }
 0x2de   : > { %1648 = vpow2.f32 %v672_v45  ;;  %v693_v47 = vsel %vm691_vm6, %v687_v46, 0 }
 0x2df   : > { %1536 = vmatpush3.bf16.msra.mxu1 %v693_v47 }
 0x2e0   : > { %1547 = vmatprep.subr.bf16.mxu1 %v1694_v2 }
 0x2e1   : > { %v736_v48 = vpop.permute.xlu1 %735 }
 0x2e2   : > { %v741_v49 = vsel %vm691_vm6, %v736_v48, 0 }
 0x2e3   : > { %1542 = vmatpush3.bf16.msra.mxu0 %v741_v49  ;;  %v1638_v49 = vld [vmem:[%s1828_s17] sm:$0xff]  }
 0x2e4   : > { %v1647_v50 = vpop.eup %1646  ;;  %1553 = vmatprep.subr.bf16.mxu0 %v1694_v2 }
 0x2e5   : > { %v674_v51 = vsel %vm661_vm5, %v1647_v50, 0.0  ;;  %v786_v54 = vpop.permute.xlu1 %785 }
 0x2e6   : > { %675 = vadd.xlane.f32.xlu0 %v674_v51  ;;  %v791_v61 = vsel %vm561_vm3, %v786_v54, 0 }
 0x2e8   : > { %v1649_v52 = vpop.eup %1648 }
 0x2e9   : > { %v677_v53 = vsel %vm661_vm5, %v1649_v52, 0.0 }
 0x2ea   : > { %678 = vadd.xlane.f32.xlu1 %v677_v53 }
 0x2fb   : > { %835 = vrot.lane.b32.xlu1 %v1849_v16, %s1698_s30  ;;  %s1115_s30 = scalar_lea.vmem %s2016_s5, %s1684_s25 }
 0x2fc   : > { %783 = vrot.lane.b32.xlu0 %v1478_v22, %s1699_s14 }
 0x2ff   : > { %833 = vrot.lane.b32.xlu1 %v1479_v24, %s1699_s14 }
 0x373   : > { %v676_v55 = vpop.xlane.xlu0 %675 }
 0x374   : > { %1650 = vrcp.f32 %v676_v55 }
 0x377   : > { %v679_v56 = vpop.xlane.xlu1 %678  ;;  %v784_v3 = vpop.permute.xlu0 %783 }
 0x378   : > { %1652 = vrcp.f32 %v679_v56 }
 0x37b   : > { %v836_v63 = vpop.permute.xlu1 %835 }
 0x37c   : > { %v841_v1 = vsel %vm561_vm3, %v836_v63, 0 }
 0x37e   : > { %v1651_v57 = vpop.eup %1650 }
 0x37f   : > { %v682_v58 = vmul.f32 %v1651_v57, %v1647_v50  ;;  %v834_v6 = vpop.permute.xlu1 %833  ;;  %v1639_v50 = vld [vmem:[%s1828_s17 + $0x8] sm:$0xff]  }
 0x381   : > { %v684_v59 = vpack.c.bf16 %v682_v58, %v682_v58 }
 0x382   : > { %v1653_v60 = vpop.eup %1652 }
 0x383   : > { %v683_v62 = vmul.f32 %v1653_v60, %v1649_v52  ;;  %1538 = vmatmul.mubr.msk.bf16.vlgmr.msra.gmra.mrb[4].mxu1 %vm661_vm5, %v684_v59 }
 0x384   : > { %1548 = vmatpush3.bf16.xpose.msra.mxu1 %v791_v61  ;;  %1549 = vmatprep.mubr.msk.bf16.mxu1 %vm1695_vm1, %v1694_v2 }
 0x385   : > { %v685_v0 = vpack.c.bf16 %v683_v62, %v683_v62  ;;  %1559 = vmatprep.subr.bf16.mxu1 %v1694_v2 }
 0x387   : > { %1544 = vmatmul.mubr.msk.bf16.vlgmr.msra.gmra.mrb[8].mxu0 %vm661_vm5, %v685_v0 }
 0x388   : > { %1554 = vmatpush3.bf16.xpose.msra.mxu0 %v841_v1  ;;  %1555 = vmatprep.mubr.msk.bf16.mxu0 %vm1695_vm1, %v1694_v2 }
 0x389   : > { %1565 = vmatprep.subr.bf16.mxu0 %v1694_v2 }
 0x38b   : > { %1550 = vmatmul.mubr.msk.bf16.vlgmr.msra.gmra.mrb[8].mxu1 %vm561_vm3, %v784_v3  ;;  %v1452_v3 = vld [vmem:[%s1022_s19] ss:$0 sm:$0xff]  ;;  %s1142_s19 = scalar_lea.vmem %s2019_s8, %s1684_s25 }
 0x38c   : > { %1561 = vmatprep.mubr.msk.bf16.mxu1 %vm1695_vm1, %v1694_v2 }
 0x38f   : > { %1556 = vmatmul.mubr.msk.bf16.vlgmr.msra.gmra.mrb[12].mxu0 %vm561_vm3, %v834_v6 }
 0x390   : > { %1567 = vmatprep.mubr.msk.bf16.mxu0 %vm1695_vm1, %v1694_v2 }
 0x456   : > { %v1902_v7 = vpop.f32.mrb[4].mxu1 }
 0x457   : > { %v1539_v8 = vpop.f32.mrb[5].mxu1 }
 0x458   : > { %v732_v9 = vpop.f32.mrb[6].mxu1 }
 0x459   : > { %v1540_v10 = vpop.f32.mrb[7].mxu1 }
 0x45a   : > { %v1904_v11 = vpop.f32.mrb[8].mxu0 }
 0x45b   : > { %v1545_v12 = vpop.f32.mrb[9].mxu0 }
 0x45c   : > { %v780_v14 = vpop.f32.mrb[10].mxu0 }
 0x45d   : > { %v1546_v15 = vpop.f32.mrb[11].mxu0 }
 0x45e   : > { %v827_v17 = vpop.f32.mrb[8].mxu1 }
 0x45f   : > { %v883_v18 = vsel %vm557_vm4, %v827_v17, -1e+30  ;;  %v1551_v19 = vpop.f32.mrb[9].mxu1 }
 0x460   : > { %v830_v20 = vpop.f32.mrb[10].mxu1  ;;  %v885_v21 = vsel %vm661_vm5, %v883_v18, -inf }
 0x461   : > { %886 = vmax.xlane.f32.xlu1 %v885_v21  ;;  %v1552_v22 = vpop.f32.mrb[11].mxu1 }
 0x462   : > { %v877_v23 = vpop.f32.mrb[12].mxu0 }
 0x463   : > { %v884_v24 = vsel %vm557_vm4, %v877_v23, -1e+30  ;;  %v1557_v25 = vpop.f32.mrb[13].mxu0 }
 0x464   : > { %v880_v28 = vpop.f32.mrb[14].mxu0  ;;  %v888_v29 = vsel %vm661_vm5, %v884_v24, -inf }
 0x465   : > { %889 = vmax.xlane.f32.xlu0 %v888_v29  ;;  %v1558_v30 = vpop.f32.mrb[15].mxu0  ;;  %v1640_v28 = vld [vmem:[%s1833_s21] sm:$0xff]   ;;  %v1641_v29 = vld [vmem:[%s1833_s21 + $0x8] sm:$0xff]  }
 0x466   : > { %v1642_v30 = vld [vmem:[%s1956_s20] sm:$0xff]  }
 0x47b   : > { %957 = vrot.lane.b32.xlu0 %v1849_v16, %s1700_s15 }
 0x4ee   : > { %v887_v31 = vpop.xlane.xlu1 %886 }
 0x4ef   : > { %v891_v32 = vsub.f32 %v883_v18, %v887_v31  ;;  %v1643_v31 = vld [vmem:[%s1956_s20 + $0x8] sm:$0xff]  }
 0x4f1   : > { %v893_v33 = vmul.f32 1.442695, %v891_v32 }
 0x4f2   : > { %v890_v34 = vpop.xlane.xlu0 %889 }
 0x4f3   : > { %1654 = vpow2.f32 %v893_v33  ;;  %v892_v35 = vsub.f32 %v884_v24, %v890_v34 }
 0x4f5   : > { %v895_v36 = vmul.f32 1.442695, %v892_v35 }
 0x4f6   : > { %v958_v37 = vpop.permute.xlu0 %957 }
 0x4f7   : > { %1656 = vpow2.f32 %v895_v36  ;;  %v963_v26 = vsel %vm691_vm6, %v958_v37, 0 }
 0x4f8   : > { %1566 = vmatpush3.bf16.msra.mxu0 %v963_v26 }
 0x4f9   : > { %1579 = vmatprep.subr.bf16.mxu0 %v1694_v2 }
 0x4fd   : > { %v1655_v27 = vpop.eup %1654 }
 0x4fe   : > { %v897_v38 = vsel %vm661_vm5, %v1655_v27, 0.0 }
 0x4ff   : > { %898 = vadd.xlane.f32.xlu1 %v897_v38 }
 0x501   : > { %v1657_v39 = vpop.eup %1656 }
 0x502   : > { %v900_v16 = vsel %vm661_vm5, %v1657_v39, 0.0 }
 0x503   : > { %901 = vadd.xlane.f32.xlu1 %v900_v16 }
 0x514   : > { %909 = vrot.lane.b32.xlu1 %v1846_v13, %s1700_s15  ;;  %s1335_s15 = scalar_lea.vmem %s2023_s12, %s1684_s25 }
 0x58c   : > { %v899_v40 = vpop.xlane.xlu1 %898 }
 0x58d   : > { %1658 = vrcp.f32 %v899_v40 }
 0x590   : > { %v902_v41 = vpop.xlane.xlu1 %901 }
 0x591   : > { %1660 = vrcp.f32 %v902_v41 }
 0x594   : > { %v910_v42 = vpop.permute.xlu1 %909 }
 0x595   : > { %v915_v43 = vsel %vm691_vm6, %v910_v42, 0 }
 0x596   : > { %1560 = vmatpush3.bf16.msra.mxu1 %v915_v43 }
 0x597   : > { %v1659_v44 = vpop.eup %1658  ;;  %1571 = vmatprep.subr.bf16.mxu1 %v1694_v2 }
 0x598   : > { %v905_v45 = vmul.f32 %v1659_v44, %v1655_v27  ;;  %v1456_v27 = vld [vmem:[%s1115_s30] ss:$0 sm:$0xff] }
 0x59a   : > { %v907_v46 = vpack.c.bf16 %v905_v45, %v905_v45 }
 0x59b   : > { %v1661_v47 = vpop.eup %1660 }
 0x59c   : > { %v906_v48 = vmul.f32 %v1661_v47, %v1657_v39  ;;  %1562 = vmatmul.mubr.msk.bf16.vlgmr.msra.gmra.mrb[12].mxu1 %vm661_vm5, %v907_v46  ;;  %v1644_v46 = vld [vmem:[%s1956_s20 + $0x10] sm:$0xff]   ;;  %v1645_v47 = vld [vmem:[%s1956_s20 + $0x18] sm:$0xff]  }
 0x59d   : > { %1575 = vmatprep.mubr.msk.bf16.mxu1 %vm1695_vm1, %v1694_v2  ;;  %1572 = vmatpush3.bf16.msra.mxu1 %v1638_v49 }
 0x59e   : > { %v908_v13 = vpack.c.bf16 %v906_v48, %v906_v48  ;;  %1573 = vmatprep.subr.bf16.mxu1 %v1694_v2  ;;  %v1459_v48 = vld [vmem:[%s1142_s19] ss:$0 sm:$0xff] }
 0x5a0   : > { %1568 = vmatmul.mubr.msk.bf16.vlgmr.msra.gmra.mrb[16].mxu0 %vm661_vm5, %v908_v13 }
 0x5a1   : > { %1583 = vmatprep.mubr.msk.bf16.mxu0 %vm1695_vm1, %v1694_v2  ;;  %1574 = vmatpush3.bf16.msra.mxu1 %v1639_v50 }
 0x5a2   : > { %1587 = vmatprep.subr.bf16.mxu1 %v1694_v2  ;;  %1580 = vmatpush3.bf16.msra.mxu0 %v1640_v28  ;;  %v1472_v28 = vld [vmem:[%s1335_s15] ss:$0 sm:$0xff] }
 0x5a3   : > { %1581 = vmatprep.subr.bf16.mxu0 %v1694_v2 }
 0x5a6   : > { %1582 = vmatpush3.bf16.msra.mxu0 %v1641_v29 }
 0x66f   : > { %v951_v51 = vpop.f32.mrb[12].mxu1 }
 0x670   : > { %v1563_v52 = vpop.f32.mrb[13].mxu1 }
 0x671   : > { %v954_v53 = vpop.f32.mrb[14].mxu1 }
 0x672   : > { %v1564_v54 = vpop.f32.mrb[15].mxu1 }
 0x673   : > { %v999_v55 = vpop.f32.mrb[16].mxu0 }
 0x674   : > { %v1631_v56 = vpack.i.bf16 %v999_v55, %v951_v51  ;;  %v1569_v57 = vpop.f32.mrb[17].mxu0 }
 0x675   : > { %v1002_v58 = vpop.f32.mrb[18].mxu0 }
 0x676   : > { %1632 = vrot.lane.b32.xlu1 %v1631_v56, %s1701_s16  ;;  %v1570_v59 = vpop.f32.mrb[19].mxu0  ;;  %s1125_s16 = scalar_lea.vmem %s2017_s6, %s1684_s25 }
 0x677   : > { %v1457_v41 = vld [vmem:[%s1125_s16] ss:$0 sm:$0xff] }
 0x6e8   : > { %v1633_v60 = vpop.permute.xlu1 %1632 }
 0x6e9   : > { %v1635_v61 = vunpack.i.h.bf16 %v1633_v60  ;;  %v1634_v62 = vunpack.i.l.bf16 %v1633_v60 }
 0x6eb   : > { %v1014_v63 = vsel %vm561_vm3, %v1904_v11, %v1635_v61  ;;  %v1013_v0 = vsel %vm561_vm3, %v1902_v7, %v1634_v62 }
 0x6ec   : > { %v1015_v1 = vpack.c.bf16 %v1014_v63, %v1013_v0 }
 0x6ee   : > { %1576 = vmatmul.mubr.msk.bf16.vlgmr.msra.gmra.mrb[16].mxu1 %vm496_vm2, %v1015_v1 }
 0x6ef   : > { %1595 = vmatprep.mubr.msk.bf16.mxu1 %vm1695_vm1, %v1694_v2  ;;  %1588 = vmatpush3.bf16.msra.mxu1 %v1642_v30 }
 0x6f0   : > { %1589 = vmatprep.subr.bf16.mxu1 %v1694_v2 }
 0x6f3   : > { %1590 = vmatpush3.bf16.msra.mxu1 %v1643_v31 }
 0x6f4   : > { %1591 = vmatprep.subr.bf16.mxu1 %v1694_v2 }
 0x6f7   : > { %1592 = vmatpush3.bf16.msra.mxu1 %v1644_v46 }
 0x6f8   : > { %1593 = vmatprep.subr.bf16.mxu1 %v1694_v2  ;;  %v1465_v2 = vld [vmem:[%s1220_s24] ss:$0 sm:$0xff] }
 0x6fb   : > { %1594 = vmatpush3.bf16.msra.mxu1 %v1645_v47 }
 0x7c1   : > { %v1079_v6 = vpop.f32.mrb[16].mxu1 }
 0x7c2   : > { %v1080_v8 = vadd.f32 %v1452_v3, %v1079_v6  ;;  %v1577_v9 = vpop.f32.mrb[17].mxu1 }
 0x7c3   : > { %v1082_v10 = vpop.f32.mrb[18].mxu1 }
 0x7c4   : > { %v1083_v12 = vadd.f32 %v1452_v3, %v1082_v10  ;;  %v1578_v11 = vpop.f32.mrb[19].mxu1  ;;  %v1086_v14 = vadd.f32 %v1080_v8, %v1815_v4 }
 0x7c6   : > { %v1088_v7 = vsel %vm496_vm2, %v1086_v14, 0.0  ;;  %v1087_v15 = vadd.f32 %v1083_v12, %v1820_v5 }
 0x7c7   : > { %1089 = vadd.xlane.f32.xlu1 %v1088_v7 }
 0x7c8   : > { %v1091_v17 = vsel %vm496_vm2, %v1087_v15, 0.0 }
 0x7c9   : > { %1092 = vadd.xlane.f32.xlu0 %v1091_v17 }
 0x854   : > { %v1090_v18 = vpop.xlane.xlu1 %1089 }
 0x855   : > { %v1095_v19 = vmul.f32 0.03125, %v1090_v18 }
 0x856   : > { %v1093_v20 = vpop.xlane.xlu0 %1092 }
 0x857   : > { %v1097_v21 = vsub.f32 %v1086_v14, %v1095_v19  ;;  %v1096_v22 = vmul.f32 0.03125, %v1093_v20 }
 0x859   : > { %v1098_v23 = vsub.f32 %v1087_v15, %v1096_v22  ;;  %v1099_v24 = vmul.f32 %v1097_v21, %v1097_v21 }
 0x85b   : > { %v1101_v4 = vsel %vm496_vm2, %v1099_v24, 0.0  ;;  %v1100_v25 = vmul.f32 %v1098_v23, %v1098_v23 }
 0x85c   : > { %1102 = vadd.xlane.f32.xlu0 %v1101_v4  ;;  %v1471_v4 = vld [vmem:[%s1325_s29] ss:$0 sm:$0xff] }
 0x85d   : > { %v1104_v5 = vsel %vm496_vm2, %v1100_v25, 0.0 }
 0x85e   : > { %1105 = vadd.xlane.f32.xlu1 %v1104_v5 }
 0x8e9   : > { %v1103_v32 = vpop.xlane.xlu0 %1102 }
 0x8ea   : > { %v1107_v33 = vmul.f32 0.03125, %v1103_v32 }
 0x8eb   : > { %v1106_v34 = vpop.xlane.xlu1 %1105 }
 0x8ec   : > { %v1109_v35 = vadd.f32 1e-05, %v1107_v33  ;;  %v1108_v36 = vmul.f32 0.03125, %v1106_v34 }
 0x8ee   : > { %1662 = vrsqrt.f32 %v1109_v35  ;;  %v1110_v37 = vadd.f32 1e-05, %v1108_v36 }
 0x8f0   : > { %1664 = vrsqrt.f32 %v1110_v37 }
 0x8f8   : > { %v1663_v26 = vpop.eup %1662 }
 0x8f9   : > { %v1113_v38 = vmul.f32 %v1663_v26, %v1097_v21 }
 0x8fa   : > { %v1665_v39 = vpop.eup %1664 }
 0x8fb   : > { %v1123_v16 = vmul.f32 %v1456_v27, %v1113_v38  ;;  %v1114_v40 = vmul.f32 %v1665_v39, %v1098_v23 }
 0x8fd   : > { %v1124_v42 = vmul.f32 %v1456_v27, %v1114_v40  ;;  %v1133_v43 = vadd.f32 %v1457_v41, %v1123_v16 }
 0x8ff   : > { %v1134_v44 = vadd.f32 %v1457_v41, %v1124_v42 }
 0x901   : > { %v1135_v45 = vpack.c.bf16 %v1134_v44, %v1133_v43 }
 0x903   : > { %1584 = vmatmul.mubr.msk.bf16.vlgmr.msra.gmra.mrb[20].mxu0 %vm496_vm2, %v1135_v45 }
 0x9d6   : > { %v1199_v13 = vpop.f32.mrb[20].mxu0 }
 0x9d7   : > { %v1200_v49 = vadd.f32 %v1459_v48, %v1199_v13  ;;  %v1585_v50 = vpop.f32.mrb[21].mxu0 }
 0x9d8   : > { %v1202_v51 = vpop.f32.mrb[22].mxu0 }
 0x9d9   : > { %v1203_v52 = vadd.f32 %v1459_v48, %v1202_v51  ;;  %v1586_v53 = vpop.f32.mrb[23].mxu0  ;;  %v1206_v54 = vmax.f32 %v1200_v49, 0.0 }
 0x9db   : > { %v1207_v55 = vmax.f32 %v1203_v52, 0.0 }
 0x9dd   : > { %v1208_v56 = vpack.c.bf16 %v1207_v55, %v1206_v54 }
 0x9df   : > { %1596 = vmatmul.mubr.msk.bf16.vlgmr.msra.gmra.mrb[20].mxu1 %vm1252_vm7, %v1208_v56 }
 0xab2   : > { %v1290_v57 = vpop.f32.mrb[20].mxu1 }
 0xab3   : > { %v1291_v58 = vadd.f32 %v1465_v2, %v1290_v57  ;;  %v1597_v59 = vpop.f32.mrb[21].mxu1 }
 0xab4   : > { %v1293_v60 = vpop.f32.mrb[22].mxu1 }
 0xab5   : > { %v1294_v61 = vadd.f32 %v1465_v2, %v1293_v60  ;;  %v1598_v62 = vpop.f32.mrb[23].mxu1  ;;  %v1297_v63 = vadd.f32 %v1291_v58, %v1133_v43 }
 0xab7   : > { %v1299_v0 = vsel %vm496_vm2, %v1297_v63, 0.0  ;;  %v1298_v1 = vadd.f32 %v1294_v61, %v1134_v44 }
 0xab8   : > { %1300 = vadd.xlane.f32.xlu0 %v1299_v0 }
 0xab9   : > { %v1302_v3 = vsel %vm496_vm2, %v1298_v1, 0.0 }
 0xaba   : > { %1303 = vadd.xlane.f32.xlu1 %v1302_v3 }
 0xb45   : > { %v1301_v6 = vpop.xlane.xlu0 %1300 }
 0xb46   : > { %v1305_v8 = vmul.f32 0.03125, %v1301_v6 }
 0xb47   : > { %v1304_v9 = vpop.xlane.xlu1 %1303 }
 0xb48   : > { %v1307_v10 = vsub.f32 %v1297_v63, %v1305_v8  ;;  %v1306_v12 = vmul.f32 0.03125, %v1304_v9 }
 0xb4a   : > { %v1308_v11 = vsub.f32 %v1298_v1, %v1306_v12  ;;  %v1309_v14 = vmul.f32 %v1307_v10, %v1307_v10 }
 0xb4c   : > { %v1311_v7 = vsel %vm496_vm2, %v1309_v14, 0.0  ;;  %v1310_v15 = vmul.f32 %v1308_v11, %v1308_v11 }
 0xb4d   : > { %1312 = vadd.xlane.f32.xlu0 %v1311_v7 }
 0xb4e   : > { %v1314_v17 = vsel %vm496_vm2, %v1310_v15, 0.0 }
 0xb4f   : > { %1315 = vadd.xlane.f32.xlu1 %v1314_v17 }
 0xbda   : > { %v1313_v18 = vpop.xlane.xlu0 %1312 }
 0xbdb   : > { %v1317_v19 = vmul.f32 0.03125, %v1313_v18 }
 0xbdc   : > { %v1316_v20 = vpop.xlane.xlu1 %1315 }
 0xbdd   : > { %v1319_v21 = vadd.f32 1e-05, %v1317_v19  ;;  %v1318_v22 = vmul.f32 0.03125, %v1316_v20 }
 0xbdf   : > { %1666 = vrsqrt.f32 %v1319_v21  ;;  %v1320_v23 = vadd.f32 1e-05, %v1318_v22 }
 0xbe1   : > { %1668 = vrsqrt.f32 %v1320_v23 }
 0xbe9   : > { %v1667_v24 = vpop.eup %1666 }
 0xbea   : > { %v1323_v25 = vmul.f32 %v1667_v24, %v1307_v10 }
 0xbeb   : > { %v1669_v5 = vpop.eup %1668 }
 0xbec   : > { %v1333_v29 = vmul.f32 %v1471_v4, %v1323_v25  ;;  %v1324_v30 = vmul.f32 %v1669_v5, %v1308_v11 }
 0xbee   : > { %v1343_v31 = vadd.f32 %v1472_v28, %v1333_v29  ;;  %v1334_v32 = vmul.f32 %v1471_v4, %v1324_v30 }
 0xbf0   : > { %1345 = vst.msk [vmem:[%s2024_s13] sm:$0xff] %vm496_vm2, %v1343_v31  ;;  %v1344_v33 = vadd.f32 %v1472_v28, %v1334_v32 }
 0xbf2   : > { %1346 = vst.msk [vmem:[%s2024_s13 + $0x8] sm:$0xff] %vm496_vm2, %v1344_v33 }
 0xbf3 PF: > { %s23_s27 = sadd.s32 1, %s1692_s27   ;;  %s2025_s25 = smov %s1688_s26 }
 0xbf4   : > { %p20_p5 = scmp.ge.s32.totalorder %s23_s27, 4   ;;  %s2026_s26 = smov %s2028_s28 }
 0xbf6   :  { %22 = sbr.rel (!%p20_p5) target bundleno = 2 (0x2), region = 118 }

</bundles_post_ra>
